<compile_context>
chip_gen: v5e
topology: v5e:2x2
jax: 0.10.0
libtpu: 0.0.40
codegen_flags: <defaults>
</compile_context>

<pallas_src>
import jax
import jax.numpy as jnp
from jax import lax
from jax.experimental import pallas as pl
from jax.experimental.pallas import tpu as pltpu

_VMEM_LIMIT = 32 * 1024 * 1024     # explicit scoped-VMEM limit; safe on v5e/v6e/v7x
_FUSED_BUDGET = 24 * 1024 * 1024   # gate for the fused whole-plane path (v7x-safe)


# ---------------------------------------------------------------------------
# Fused single-pass path (plane fits VMEM).
# ---------------------------------------------------------------------------
def _softmax2d_fused_kernel(x_ref, o_ref):
    x = x_ref[...].astype(jnp.float32)                                  # (1, N, N)
    m = jnp.max(jnp.max(x, axis=2, keepdims=True), axis=1, keepdims=True)
    e = jnp.exp(x - m)
    s = jnp.sum(jnp.sum(e, axis=2, keepdims=True), axis=1, keepdims=True)
    o_ref[...] = (e * (1.0 / s)).astype(o_ref.dtype)                    # exact recip


def _softmax2d_fused(x):
    B, N, _ = x.shape
    isz = jnp.dtype(x.dtype).itemsize
    spec = pl.BlockSpec((1, N, N), lambda b: (b, 0, 0))
    return pl.pallas_call(
        _softmax2d_fused_kernel,
        out_shape=jax.ShapeDtypeStruct((B, N, N), x.dtype),
        grid_spec=pltpu.PrefetchScalarGridSpec(
            num_scalar_prefetch=0, grid=(B,), in_specs=[spec], out_specs=spec),
        compiler_params=pltpu.CompilerParams(
            dimension_semantics=("parallel",),
            vmem_limit_bytes=_VMEM_LIMIT),
        cost_estimate=pl.CostEstimate(
            flops=4 * B * N * N,
            transcendentals=B * N * N,
            bytes_accessed=2 * B * N * N * isz),
    )(x)


# ---------------------------------------------------------------------------
# Two-pass fallback (large N): online logsumexp + elementwise apply.
# ---------------------------------------------------------------------------
def _make_stats_kernel(n_rows, tr, needs_mask):
    def kernel(x_ref, c_ref, m_sc, s_sc):
        t = pl.program_id(1)

        @pl.when(t == 0)
        def _():
            m_sc[...] = jnp.full_like(m_sc, -jnp.inf)
            s_sc[...] = jnp.zeros_like(s_sc)

        x = x_ref[...].astype(jnp.float32)                              # (1, TR, N)
        if needs_mask:
            # Ragged last tile: rows beyond N contribute -inf (i.e. nothing).
            rows = t * tr + lax.broadcasted_iota(jnp.int32, x.shape, 1)
            x = jnp.where(rows < n_rows, x, -jnp.inf)

        # Tile-local stats first (independent of the loop-carried running max),
        # then a cheap scalar merge -> vector work overlaps the next tile's DMA.
        tmax = jnp.max(jnp.max(x, axis=2, keepdims=True), axis=1, keepdims=True)
        tsum = jnp.sum(jnp.sum(jnp.exp(x - tmax), axis=2, keepdims=True),
                       axis=1, keepdims=True)

        m_old = m_sc[...]
        m_new = jnp.maximum(m_old, tmax)
        s_sc[...] = (s_sc[...] * jnp.exp(m_old - m_new)
                     + tsum * jnp.exp(tmax - m_new))
        m_sc[...] = m_new

        @pl.when(t == pl.num_programs(1) - 1)
        def _():
            c_ref[...] = m_sc[...] + jnp.log(s_sc[...])                 # logsumexp

    return kernel


def _softmax2d_apply_kernel(c_ref, x_ref, o_ref):
    """Pass 2: out = exp(x - c); c is a per-batch scalar held in SMEM."""
    c = c_ref[pl.program_id(0)]
    o_ref[...] = jnp.exp(x_ref[...].astype(jnp.float32) - c).astype(o_ref.dtype)


def _softmax2d_two_pass(x, tr):
    B, N, _ = x.shape
    isz = jnp.dtype(x.dtype).itemsize
    n_tiles = pl.cdiv(N, tr)
    needs_mask = (N % tr) != 0
    nbytes = B * N * N * isz

    x_spec1 = pl.BlockSpec((1, tr, N), lambda b, t: (b, t, 0))
    stat_spec = pl.BlockSpec((1, 1, 1), lambda b, t: (b, 0, 0))

    # Pass 1: per-batch logsumexp constant.
    c = pl.pallas_call(
        _make_stats_kernel(N, tr, needs_mask),
        out_shape=jax.ShapeDtypeStruct((B, 1, 1), jnp.float32),
        grid_spec=pltpu.PrefetchScalarGridSpec(
            num_scalar_prefetch=0,
            grid=(B, n_tiles),
            in_specs=[x_spec1],
            out_specs=stat_spec,
            scratch_shapes=[pltpu.VMEM((1, 1, 1), jnp.float32),
                            pltpu.VMEM((1, 1, 1), jnp.float32)]),
        compiler_params=pltpu.CompilerParams(
            dimension_semantics=("parallel", "arbitrary"),
            vmem_limit_bytes=_VMEM_LIMIT),
        cost_estimate=pl.CostEstimate(
            flops=3 * B * N * N,
            transcendentals=B * N * N,
            bytes_accessed=nbytes + B * 4),
    )(x)

    # Pass 2: normalize.  c goes to SMEM via scalar prefetch (no tiny padded
    # VMEM stat streams, no per-element divide).
    x_spec2 = pl.BlockSpec((1, tr, N), lambda b, t, c_sref: (b, t, 0))
    out = pl.pallas_call(
        _softmax2d_apply_kernel,
        out_shape=jax.ShapeDtypeStruct((B, N, N), x.dtype),
        grid_spec=pltpu.PrefetchScalarGridSpec(
            num_scalar_prefetch=1,
            grid=(B, n_tiles),
            in_specs=[x_spec2],
            out_specs=x_spec2),
        compiler_params=pltpu.CompilerParams(
            dimension_semantics=("parallel", "parallel"),
            vmem_limit_bytes=_VMEM_LIMIT),
        cost_estimate=pl.CostEstimate(
            flops=B * N * N,
            transcendentals=B * N * N,
            bytes_accessed=2 * nbytes + B * 4),
    )(c.reshape(B), x)
    return out


# ---------------------------------------------------------------------------
# Dispatch.
# ---------------------------------------------------------------------------
def _pick_row_tile(n, itemsize, target_bytes=4 * 1024 * 1024):
    """Dtype-aware row tile: multiple of the packed sublane count, ~target
    bytes of f32 working set per tile, dividing n when possible."""
    sub = max(8, 32 // itemsize)             # 8 rows f32, 16 bf16, 32 int8/fp8
    if n * n * 4 <= target_bytes:
        return n
    max_rows = max(sub, target_bytes // (n * 4))
    cand = max(sub, (max_rows // sub) * sub)
    c = cand
    while c >= sub:
        if n % c == 0:
            return c
        c -= sub
    return cand                               # ragged: last tile masked in-kernel


def softmax2d(x, *, row_tile=None):
    """Pallas equivalent of Softmax2d.forward for x of shape (B, N, N)."""
    assert x.ndim == 3 and x.shape[1] == x.shape[2]
    B, N, _ = x.shape
    isz = jnp.dtype(x.dtype).itemsize

    if row_tile is None:
        # Fused whole-plane path when in+out (double-buffered) + f32 temps fit.
        fused_bytes = N * N * (4 * isz + 8)
        if fused_bytes <= _FUSED_BUDGET:
            return _softmax2d_fused(x)
        tr = _pick_row_tile(N, isz)
    else:
        tr = min(int(row_tile), N)
        if tr != N and tr % 8 != 0:
            tr = N                             # keep the block layout legal
    return _softmax2d_two_pass(x, tr)


if __name__ == "__main__":
    key = jax.random.PRNGKey(0)

    # Small demo matching the module (fused single-pass path).
    B, N = 2, 16
    x = jax.random.normal(key, (B, N, N), dtype=jnp.float32)
    out = jax.block_until_ready(softmax2d(x))
    ref = jax.nn.softmax(x.reshape(B, -1), axis=-1).reshape(B, N, N)
    assert out.shape == (B, N, N)
    assert out.dtype == x.dtype
    assert jnp.allclose(out, ref, atol=1e-6, rtol=1e-5)
    assert jnp.allclose(jnp.sum(out.reshape(B, -1), axis=-1), 1.0, atol=1e-5)

    # Two-pass path: multi-tile online logsumexp + SMEM-constant apply.
    k2 = jax.random.split(key)[0]
    x2 = jax.random.normal(k2, (2, 128, 128), dtype=jnp.float32)
    out2 = jax.block_until_ready(softmax2d(x2, row_tile=32))
    ref2 = jax.nn.softmax(x2.reshape(2, -1), axis=-1).reshape(2, 128, 128)
    assert jnp.allclose(out2, ref2, atol=1e-6, rtol=1e-5)

    # Ragged path: N not divisible by the row tile (masked last tile).
    k3 = jax.random.split(key, 3)[2]
    x3 = jax.random.normal(k3, (2, 72, 72), dtype=jnp.float32)
    out3 = jax.block_until_ready(softmax2d(x3, row_tile=32))
    ref3 = jax.nn.softmax(x3.reshape(2, -1), axis=-1).reshape(2, 72, 72)
    assert jnp.allclose(out3, ref3, atol=1e-6, rtol=1e-5)

    print("KERNEL_OK")
</pallas_src>

<mosaic_0001>
module attributes {stable_mosaic.version = 11 : i64} {
  func.func @_softmax2d_fused_kernel(%arg0: i32, %arg1: memref<1x16x16xf32, #tpu.memory_space<vmem>>, %arg2: memref<1x16x16xf32, #tpu.memory_space<vmem>>) attributes {dimension_semantics = [#tpu.dimension_semantics<parallel>], iteration_bounds = array<i64: 2>, scalar_prefetch = 0 : i64, scratch_operands = 0 : i64, tpu.core_type = #tpu.core_type<tc>, window_params = [{transform_indices = @transform_0, window_bounds = array<i64: 1, 16, 16>}, {transform_indices = @transform_1, window_bounds = array<i64: 1, 16, 16>}]} {
    %c0 = arith.constant 0 : index
    %c0_0 = arith.constant 0 : index
    %c0_1 = arith.constant 0 : index
    %0 = vector.load %arg1[%c0, %c0_0, %c0_1] : memref<1x16x16xf32, #tpu.memory_space<vmem>>, vector<1x16x16xf32>
    %cst = arith.constant dense<0xFF800000> : vector<1x16xf32>
    %1 = vector.multi_reduction <maximumf>, %0, %cst [2] : vector<1x16x16xf32> to vector<1x16xf32>
    %2 = vector.shape_cast %1 : vector<1x16xf32> to vector<1x16x1xf32>
    %cst_2 = arith.constant dense<0xFF800000> : vector<1x1xf32>
    %3 = vector.multi_reduction <maximumf>, %2, %cst_2 [1] : vector<1x16x1xf32> to vector<1x1xf32>
    %4 = vector.shape_cast %3 : vector<1x1xf32> to vector<1x1x1xf32>
    %5 = vector.broadcast %4 : vector<1x1x1xf32> to vector<1x16x16xf32>
    %6 = arith.subf %0, %5 : vector<1x16x16xf32>
    %7 = math.exp %6 : vector<1x16x16xf32>
    %cst_3 = arith.constant dense<0.000000e+00> : vector<1x16xf32>
    %8 = vector.multi_reduction <add>, %7, %cst_3 [2] : vector<1x16x16xf32> to vector<1x16xf32>
    %9 = vector.shape_cast %8 : vector<1x16xf32> to vector<1x16x1xf32>
    %cst_4 = arith.constant dense<0.000000e+00> : vector<1x1xf32>
    %10 = vector.multi_reduction <add>, %9, %cst_4 [1] : vector<1x16x1xf32> to vector<1x1xf32>
    %11 = vector.shape_cast %10 : vector<1x1xf32> to vector<1x1x1xf32>
    %cst_5 = arith.constant 1.000000e+00 : f32
    %12 = vector.broadcast %cst_5 : f32 to vector<1x1x1xf32>
    %13 = arith.divf %12, %11 : vector<1x1x1xf32>
    %14 = vector.broadcast %13 : vector<1x1x1xf32> to vector<1x16x16xf32>
    %15 = arith.mulf %7, %14 : vector<1x16x16xf32>
    %c0_6 = arith.constant 0 : index
    %c0_7 = arith.constant 0 : index
    %c0_8 = arith.constant 0 : index
    %16 = vector.load %arg2[%c0_6, %c0_7, %c0_8] : memref<1x16x16xf32, #tpu.memory_space<vmem>>, vector<1x16x16xf32>
    tpu.vector_store %arg2[%c0_6, %c0_7, %c0_8], %15 {strides = array<i32>} : memref<1x16x16xf32, #tpu.memory_space<vmem>>, vector<1x16x16xf32>,
    return
  }
  func.func @transform_0(%arg0: i32) -> (i32, i32, i32) {
    %c0_i32 = arith.constant 0 : i32
    %c0_i32_0 = arith.constant 0 : i32
    %c0_i32_1 = arith.constant 0 : i32
    return %arg0, %c0_i32, %c0_i32_0 : i32, i32, i32
  }
  func.func @transform_1(%arg0: i32) -> (i32, i32, i32) {
    %c0_i32 = arith.constant 0 : i32
    %c0_i32_0 = arith.constant 0 : i32
    %c0_i32_1 = arith.constant 0 : i32
    return %arg0, %c0_i32, %c0_i32_0 : i32, i32, i32
  }
}

</mosaic_0001>

<bundles_post_ra>
// kernel: tpu_custom_call.1
= control target key start
LH: loop header
LB: loop body
LE: loop exit
PB: predicated region body
PF: predicated region fallthrough
CT: control target
= control target key end

     0   :  { %6 = vsyncpa [#allocation3], 0  ;;  %s601_s0 = inlined_call_operand.hbm [shape: f32[2,16,16], index: 0, kind: input, shape index: {}]   ;;  %s602_s1 = inlined_call_operand.hbm [shape: f32[2,16,16], index: 1, kind: output, shape index: {}]  }
   0x1   :  { %8 = vsyncpa [#allocation3 + $0x1], 0 }
   0x2   :  { %9 = vsyncpa [#allocation4], 0 }
   0x3   :  { %11 = vsyncpa [#allocation4 + $0x1], 0  ;;  %s464_s6 = smov 0   ;;  %s466_s7 = smov 0  }
   0x4   :  { %s468_s8 = smov 0   ;;  %s470_s9 = smov 0  }
   0x5 LB: > { %s485_s10 = sadd.s32 4294967295, %s448_s9   ;;  %s280_s11 = sadd.s32 4294967294, %s448_s9   ;;  %s448_s9 = sphi %s470_s9, %s612_s9   ;;  %s444_s8 = sphi %s468_s8, %s611_s8   ;;  %s440_s7 = sphi %s466_s7, %s610_s7   ;;  %s436_s6 = sphi %s464_s6, %s609_s6  }
   0x6   : > { %s489_s12 = sadd.s32 1, %s448_s9   ;;  %s24_s13 = sadd.s32 1, %s444_s8 }
   0x7   : > { %s21_s14 = ssub.s32 %s448_s9, %s489_s12  ;;  %p31_p0 = scmp.ne.s32.totalorder %s444_s8, %s440_s7 }
   0x8   : > { %p22_p1 = scmp.eq.s32.totalorder %s21_s14, 0  ;;  %p32_p2 = scmp.eq.s32.totalorder %s448_s9, 0 }
   0x9   : > { %p37_p3 = scmp.ne.s32.totalorder %s440_s7, %s436_s6  ;;  %p38_p4 = scmp.eq.s32.totalorder %s485_s10, 0 }
   0xa   : > { %s501_s15 = scalar_select %p22_p1, %s444_s8, %s24_s13  }
   0xb   : > { %p503_p5 = por %p32_p2, %p31_p0  ;;  %p507_p6 = por %p38_p4, %p37_p3 }
   0xc   : > { %p61_p7 = scmp.eq.s32.totalorder %s485_s10, 1  ;;  %p67_p8 = scmp.eq.s32.totalorder %s280_s11, 1 }
   0xd   : > { %p308_p10 = scmp.lt.s32.totalorder %s448_s9, 2  ;;  %s87_s20 = sand.u32 1, %s444_s8  }
   0xe   : > { %p514_p11 = por %p61_p7, %p31_p0  ;;  %p518_p12 = por %p67_p8, %p37_p3 }
   0xf   : > { %s294_s21 = sshll.u32 %s448_s9, 4  ;;  %s283_s22 = sshll.u32 %s87_s20, 4 }
  0x10   : > { %s96_s25 = scalar_lea.hbm %s601_s0, %s294_s21  ;;  %s91_s27 = scalar_lea.vmem [#allocation2], %s283_s22 }
  0x11   : > { %s97_s26 = sshll.u32 %s96_s25, 4  ;;  %s99_s28 = sshll.u32 %s91_s27, 4  ;;  %s98_s26 = int_to_ptr.hbm [resolvable:$true] %s97_s26  ;;  %s100_s28 = int_to_ptr.vmem [resolvable:$true] %s99_s28 }
  0x12   : > { %p529_p13 = pnand %p308_p10, %p503_p5  ;;  %p286_p0 = scmp.ge.s32.totalorder %s448_s9, 1 }
  0x13   : > { %p107_p1 = scmp.lt.s32.totalorder %s448_s9, 3  ;;  %s88_s30 = scalar_lea.sflag [#allocation3], %s87_s20 }
  0x14   : > { %s352_s2 = sshra.s32 %s98_s26, 4  ;;  %p356_p3 = pneg %p529_p13  ;;  %s353_s2 = int_to_ptr.hbm [resolvable:$true] %s352_s2 }
  0x15   : > { %s354_s3 = scalar_lea.hbm %s353_s2, 16  ;;  %s359_s11 = scalar_lea.hbm %s601_s0, 32 }
  0x16   : > { %p355_p2 = scmp.ne.s32.totalorder %s353_s2, %s354_s3  ;;  %p360_p5 = scmp.lt.s32.totalorder %s353_s2, %s601_s0 }
  0x17   : > { %p361_p8 = scmp.lt.s32.totalorder %s359_s11, %s354_s3 }
  0x18   : > { %p357_p4 = pnand %p356_p3, %p355_p2 }
  0x19   : > { %p362_p10 = por %p361_p8, %p360_p5 }
  0x1a   : > { %p358_p7 = pneg %p357_p4 }
  0x1c   : > { %p363_p9 = pnand %p362_p10, %p358_p7 }
  0x1e   : > { %366 = shalt.err (!%p363_p9)
}
  0x1f   : > { %s450_s16 = smov 128   ;;  %s451_s20 = smov 8  }
  0x20   : > { %303 = dma.hbm_to_vmem [thread:$0]  (!%p529_p13), %s98_s26, 256, %s100_s28, %s88_s30, %s450_s16, %s450_s16, %s451_s20  }
  0x21   : > { %p108_p2 = pnand %p286_p0, %p107_p1 }
  0x22   : > { %s550_s21 = sand.u32 (!%p108_p2), 1, %s440_s7  }
  0x23   : > { %111 = sbr.rel (%p108_p2) target bundleno = 355 (0x163), region = 24  ;;  %s287_s22 = sshll.u32 (!%p108_p2), %s550_s21, 4 }
  0x24   : > { %s114_s23 = scalar_lea.sflag (!%p108_p2), [#allocation3], %s550_s21  ;;  %s117_s24 = scalar_lea.vmem (!%p108_p2), [#allocation2], %s287_s22 }
  0x28   : > { %427 = dma.done.wait (%p507_p6), %s114_s23, 256  }
  0x29   : > { %429 = vsyncadd (%p507_p6), %s114_s23, 4294967040  ;;  %vm139_vm0 = vcmask 130048   ;;  %v137_v0 = vld [vmem:[%s117_s24] sm:$0xff]  ;;  %v138_v2 = vld [vmem:[%s117_s24 + $0x8] sm:$0xff]  ;;  %s295_s17 = sshll.u32 %s485_s10, 4  ;;  %s136_s28 = scalar_lea.vmem [#allocation5], %s287_s22 }
  0x2a   : > { %v140_v1 = vsel %vm139_vm0, %v137_v0, -inf  ;;  %v143_v3 = vsel %vm139_vm0, %v138_v2, -inf  ;;  %s203_s27 = scalar_lea.hbm %s602_s1, %s295_s17  ;;  %s204_s29 = sshll.u32 %s136_s28, 4  ;;  %s205_s29 = int_to_ptr.vmem [resolvable:$true] %s204_s29 }
  0x2b   : > { %141 = vmax.xlane.f32.xlu0 %v140_v1  ;;  %s206_s30 = sshll.u32 %s203_s27, 4  ;;  %s192_s10 = scalar_lea.sflag [#allocation4], %s550_s21  ;;  %s207_s30 = int_to_ptr.hbm [resolvable:$true] %s206_s30 }
  0x2c   : > { %s396_s2 = sshra.s32 %s207_s30, 4  ;;  %s402_s11 = scalar_lea.hbm %s602_s1, 32  ;;  %s397_s2 = int_to_ptr.hbm [resolvable:$true] %s396_s2 }
  0x2d   : > { %s398_s3 = scalar_lea.hbm %s397_s2, 16  ;;  %p403_p0 = scmp.lt.s32.totalorder %s397_s2, %s602_s1 }
  0x2e   : > { %p399_p6 = scmp.ne.s32.totalorder %s397_s2, %s398_s3  ;;  %p404_p1 = scmp.lt.s32.totalorder %s402_s11, %s398_s3 }
  0x30   : > { %p400_p9 = pnand %p399_p6, %p514_p11  ;;  %p405_p3 = por %p404_p1, %p403_p0 }
  0x32   : > { %p401_p13 = pneg %p400_p9 }
  0x33   : > { %144 = vmax.xlane.f32.xlu0 %v143_v3 }
  0x34   : > { %p406_p4 = pnand %p405_p3, %p401_p13 }
  0x9e   : > { %v142_v4 = vpop.xlane.xlu0 %141 }
  0xa6   : > { %v145_v5 = vpop.xlane.xlu0 %144 }
  0xa7   : > { %v146_v6 = vmax.f32 %v142_v4, %v145_v5 }
  0xa9   : > { %v147_v7 = vrot.slane %v146_v6, 4 }
  0xab   : > { %v148_v8 = vmax.f32 %v146_v6, %v147_v7 }
  0xad   : > { %v149_v9 = vrot.slane %v148_v8, 2 }
  0xaf   : > { %v150_v10 = vmax.f32 %v148_v8, %v149_v9 }
  0xb1   : > { %v151_v11 = vrot.slane %v150_v10, 1 }
  0xb3   : > { %v152_v12 = vmax.f32 %v150_v10, %v151_v11 }
  0xb5   : > { %v153_v13 = vsub.f32 %v137_v0, %v152_v12  ;;  %v154_v15 = vsub.f32 %v138_v2, %v152_v12 }
  0xb7   : > { %v155_v14 = vmul.f32 1.442695, %v153_v13  ;;  %v157_v16 = vmul.f32 1.442695, %v154_v15 }
  0xb9   : > { %346 = vpow2.f32 %v155_v14 }
  0xba   : > { %348 = vpow2.f32 %v157_v16 }
  0xbf   : > { %v347_v17 = vpop.eup %346 }
  0xc0   : > { %v159_v18 = vsel %vm139_vm0, %v347_v17, 0.0  ;;  %v349_v19 = vpop.eup %348 }
  0xc1   : > { %160 = vadd.xlane.f32.xlu1 %v159_v18  ;;  %v162_v20 = vsel %vm139_vm0, %v349_v19, 0.0 }
  0xc9   : > { %163 = vadd.xlane.f32.xlu1 %v162_v20 }
 0x134   : > { %v161_v21 = vpop.xlane.xlu1 %160 }
 0x13c   : > { %v164_v22 = vpop.xlane.xlu1 %163 }
 0x13d   : > { %v165_v23 = vadd.f32 %v164_v22, %v161_v21 }
 0x13f   : > { %v166_v24 = vrot.slane %v165_v23, 4 }
 0x141   : > { %v167_v25 = vadd.f32 %v166_v24, %v165_v23 }
 0x143   : > { %v168_v26 = vrot.slane %v167_v25, 2 }
 0x145   : > { %v169_v27 = vadd.f32 %v168_v26, %v167_v25 }
 0x147   : > { %v170_v28 = vrot.slane %v169_v27, 1 }
 0x149   : > { %v171_v29 = vadd.f32 %v170_v28, %v169_v27 }
 0x14b   : > { %350 = vrcp.f32 %v171_v29  ;;  %v183_v33 = vand.u32 2147483648, %v171_v29  ;;  %v181_v35 = vand.u32 2147483647, %v171_v29  ;;  %vm177_vm2 = vweird.f32 %v171_v29 }
 0x14d   : > { %v184_v37 = vor.u32 1.1754944e-38, %v183_v33  ;;  %vm182_vm4 = vcmp.eq.f32.partialorder %v181_v35, 8.507059e+37 }
 0x151   : > { %v351_v30 = vpop.eup %350 }
 0x152   : > { %v173_v31 = vmul.f32 %v351_v30, %v171_v29  ;;  %vm178_vm1 = vweird.f32 %v351_v30 }
 0x153   : > { %vm179_vm3 = vmor %vm177_vm2, %vm178_vm1 }
 0x154   : > { %v174_v32 = vsub.f32 1.0, %v173_v31 }
 0x156   : > { %v175_v34 = vmul.f32 %v351_v30, %v174_v32 }
 0x158   : > { %v176_v36 = vadd.f32 %v351_v30, %v175_v34 }
 0x15a   : > { %v180_v38 = vsel %vm179_vm3, %v351_v30, %v176_v36 }
 0x15b   : > { %v185_v39 = vsel %vm182_vm4, %v184_v37, %v180_v38 }
 0x15c   : > { %v187_v40 = vmul.f32 %v347_v17, %v185_v39  ;;  %v188_v41 = vmul.f32 %v349_v19, %v185_v39 }
 0x15e   : > { %189 = vst.msk [vmem:[%s136_s28] sm:$0xff] %vm139_vm0, %v187_v40 }
 0x15f   : > { %190 = vst.msk [vmem:[%s136_s28 + $0x8] sm:$0xff] %vm139_vm0, %v188_v41 }
 0x160   : > { %409 = shalt.err (!%p406_p4)
}
 0x161   : > { %s452_s16 = smov 128   ;;  %s453_s20 = smov 8  }
 0x162   : > { %298 = dma.vmem_to_hbm [thread:$0]  (%p514_p11), %s205_s29, 256, %s207_s30, %s192_s10, %s452_s16, %s452_s16, %s453_s20  }
 0x163 PF: > { %s221_s21 = sand.u32 1, %s436_s6   ;;  %p608_p7 = scmp.ge.s32.totalorder %s448_s9, 2 }
 0x164   : > { %s222_s22 = scalar_lea.sflag [#allocation4], %s221_s21 }
 0x165   : > { %p305_p5 = pnand %p608_p7, %p518_p12 }
 0x167   : > { %p306_p8 = pneg %p305_p5 }
 0x169   : > { %431 = dma.done.wait (%p306_p8), %s222_s22, 256  }
 0x16a   : > { %433 = vsyncadd (%p306_p8), %s222_s22, 4294967040  ;;  %p14_p10 = scmp.ge.s32.totalorder %s489_s12, 4   ;;  %s609_s6 = smov %s440_s7 }
 0x16b   : > { %s610_s7 = smov %s444_s8  ;;  %s611_s8 = smov %s501_s15 }
 0x16c   : > { %s612_s9 = smov %s489_s12  ;;  %16 = sbr.rel (!%p14_p10) target bundleno = 5 (0x5), region = 69 }
 0x171   :  { %228 = vsyncpa [#allocation3], 1 }
 0x172   :  { %230 = vsyncpa [#allocation3 + $0x1], 1 }
 0x173   :  { %231 = vsyncpa [#allocation4], 1 }
 0x174   :  { %233 = vsyncpa [#allocation4 + $0x1], 1 }

</bundles_post_ra>
